<compile_context>
chip_gen: v7x
topology: tpu7x:2x2x1
jax: 0.10.0
libtpu: 0.0.40
codegen_flags: <defaults>
</compile_context>

<pallas_src>
import functools

import jax
import jax.numpy as jnp
from jax.experimental import pallas as pl
from jax.experimental.pallas import tpu as pltpu


def _basic_net_kernel(x_ref, scale_ref, o_ref):
    # Scalar reads from SMEM; pure scalar math; scalar store to SMEM.
    d = x_ref[0] - 2.0
    o_ref[0] = scale_ref[0] * d * d


_basic_net_call = pl.pallas_call(
    _basic_net_kernel,
    out_shape=jax.ShapeDtypeStruct((1,), jnp.float32),
    in_specs=[
        pl.BlockSpec(memory_space=pltpu.MemorySpace.SMEM),
        pl.BlockSpec(memory_space=pltpu.MemorySpace.SMEM),
    ],
    out_specs=pl.BlockSpec(memory_space=pltpu.MemorySpace.SMEM),
    # Output reuses x_param's (1,) f32 buffer — x_param is dead after the call.
    input_output_aliases={0: 0},
    # Tell XLA this custom call is essentially free (3 flops, 12 bytes).
    cost_estimate=pl.CostEstimate(flops=3, transcendentals=0, bytes_accessed=12),
)


@functools.partial(jax.jit, donate_argnums=(0,))
def basic_network_no_input(x_param: jax.Array, scale_param: jax.Array) -> jax.Array:
    """Pallas equivalent of BasicNetworkNoInput.forward().

    x_param, scale_param: float32 arrays of shape (1,)
    (mirroring nn.Parameter(tensor([1.0]))).  Returns float32 array of shape (1,).
    x_param is donated / aliased onto the output.
    """
    return _basic_net_call(x_param, scale_param)


if __name__ == "__main__":
    # Deterministic parameter init mirroring the module's __init__:
    #   self.x = nn.Parameter(tensor([1.0])); self.scale = nn.Parameter(tensor([1.0]))
    key = jax.random.PRNGKey(0)  # unused (constant init), kept for convention
    x_param = jnp.array([1.0], dtype=jnp.float32)
    scale_param = jnp.array([1.0], dtype=jnp.float32)

    # Reference computed BEFORE the kernel call (x_param is donated to it):
    # scale * (x - 2)^2 = 1 * (1 - 2)^2 = 1
    expected = scale_param * (x_param - 2.0) ** 2

    res = basic_network_no_input(x_param, scale_param)
    jax.block_until_ready(res)

    assert res.shape == (1,), res.shape
    assert jnp.allclose(res, expected), (res, expected)
    print("KERNEL_OK")
</pallas_src>

<mosaic_0001>
module attributes {stable_mosaic.version = 11 : i64} {
  func.func @_basic_net_kernel(%arg0: memref<1xf32, #tpu.memory_space<smem>>, %arg1: memref<1xf32, #tpu.memory_space<smem>>, %arg2: memref<1xf32, #tpu.memory_space<smem>>) attributes {dimension_semantics = [], scalar_prefetch = 0 : i64, scratch_operands = 0 : i64, tpu.core_type = #tpu.core_type<tc>} {
    %c0 = arith.constant 0 : index
    %0 = memref.load %arg0[%c0] : memref<1xf32, #tpu.memory_space<smem>>
    %cst = arith.constant 2.000000e+00 : f32
    %1 = arith.subf %0, %cst : f32
    %c0_0 = arith.constant 0 : index
    %2 = memref.load %arg1[%c0_0] : memref<1xf32, #tpu.memory_space<smem>>
    %3 = arith.mulf %2, %1 : f32
    %4 = arith.mulf %3, %1 : f32
    %c0_1 = arith.constant 0 : index
    %5 = memref.load %arg2[%c0_1] : memref<1xf32, #tpu.memory_space<smem>>
    memref.store %4, %arg2[%c0_1] : memref<1xf32, #tpu.memory_space<smem>>
    return
  }
}

</mosaic_0001>

<bundles_post_ra>
// kernel: basic_network_no_input.1
= control target key start
LH: loop header
LB: loop body
LE: loop exit
PB: predicated region body
PF: predicated region fallthrough
CT: control target
= control target key end

     0   :  { %9 = vsyncpa [#allocation5], 0  ;;  %s82_s0 = inlined_call_operand.<no memory space> [shape: f32[1], index: 0, kind: input, shape index: {}, may-alias: {0,2}]   ;;  %s83_s1 = inlined_call_operand.<no memory space> [shape: f32[1], index: 1, kind: input, shape index: {}]   ;;  %s84_s2 = inlined_call_operand.hbm [shape: f32[1], index: 2, kind: output, shape index: {}, may-alias: {0,2}]  }
   0x1   :  { %s34_s11 = sadd.f32 -2.0, %s82_s0  ;;  %s36_s18 = scalar_lea.hbm %s84_s2, 16 }
   0x2   :  { %p37_p0 = scmp.ne.s32.totalorder %s84_s2, %s36_s18  ;;  %p40_p1 = scmp.lt.u32.totalorder %s36_s18, %s84_s2 }
   0x3   :  { %s17_s14 = smul.f32 %s34_s11, %s83_s1 }
   0x4   :  { %p42_p2 = pnand %p40_p1, %p37_p0 }
   0x5   :  { %s18_s15 = smul.f32 %s34_s11, %s17_s14 }
   0x7   :  { %20 = sst [smem:[#allocation4]] %s18_s15 }
   0x8   :  { %45 = shalt.err (!%p42_p2)
}
   0x9   :  { %s48_s0 = smov [#allocation4]  }
   0xa   :  { %28 = dma.smem_to_hbm %s48_s0, 16, %s84_s2, [#allocation5]  }
   0xb   :  { %46 = dma.done.wait [#allocation5], 16  }
   0xc   :  { %47 = vsyncadd [#allocation5], 4294967280 }
   0xd   :  { %32 = sfence }
   0xe   :  { %33 = vsyncpa [#allocation5], 1 }

</bundles_post_ra>
